<compile_context>
chip_gen: v6e
topology: v6e:2x2x1
jax: 0.10.0
libtpu: 0.0.40
codegen_flags: <defaults>
</compile_context>

<pallas_src>
import functools

import jax
import jax.numpy as jnp
from jax import lax
from jax.experimental import pallas as pl
from jax.experimental.pallas import tpu as pltpu


# --------------------------------------------------------------------------- #
# Helpers
# --------------------------------------------------------------------------- #
def _round_up(x, m):
    return ((x + m - 1) // m) * m


def _focal_pow(base, gamma):
    """(1 - pt)**gamma, specialised at trace time for integer gamma."""
    g = float(gamma)
    if g.is_integer() and g >= 0:
        gi = int(g)
        if gi == 0:
            return jnp.ones_like(base)
        return lax.integer_pow(base, gi)       # VPU multiplies, no EUP
    return jnp.power(base, g)                  # general (transcendental) path


# --------------------------------------------------------------------------- #
# Binary (C == 2) path: lane-dense (rows, 128) layout
# --------------------------------------------------------------------------- #
def _focal_binary_kernel(x_ref, t_ref, out_ref, acc_ref, *, alpha, gamma,
                         n_total):
    i = pl.program_id(0)
    last = pl.num_programs(0) - 1

    @pl.when(i == 0)
    def _init():
        acc_ref[...] = jnp.zeros_like(acc_ref)

    # x_ref: (2, tile_rows, 128) in source dtype; t_ref: (tile_rows, 128) i32.
    x0 = x_ref[0].astype(jnp.float32)          # (tile_rows, 128) class-0 logit
    x1 = x_ref[1].astype(jnp.float32)          # (tile_rows, 128) class-1 logit
    t = t_ref[...]                             # (tile_rows, 128) int32

    # 2-class logsumexp: one EUP exp + one EUP log per element.
    m = jnp.maximum(x0, x1)
    e = jnp.exp(-jnp.abs(x0 - x1))             # = exp(min - max), in (0, 1]
    sumexp = 1.0 + e
    lse = m + jnp.log(sumexp)                  # logsumexp(x0, x1)

    x_tgt = jnp.where(t == 1, x1, x0)
    bce = lse - x_tgt                          # -log_softmax[target]

    # pt = exp(-bce) = exp(x_tgt - m) / sumexp; exp(x_tgt - m) is 1 when the
    # target logit is the max, else e  ->  reuse e, no second EUP exp.
    e_tgt = jnp.where(x_tgt == m, 1.0, e)
    pt = e_tgt / sumexp

    tf = t.astype(jnp.float32)
    at = alpha * tf + (1.0 - alpha) * (1.0 - tf)
    acc_ref[...] += at * _focal_pow(1.0 - pt, gamma) * bce

    @pl.when(i == last)
    def _finalize():
        out_ref[0, 0] = jnp.sum(acc_ref[...]) * (1.0 / n_total)


def _choose_tile_rows_binary(n, itemsize):
    # Per dense row of 128 lanes (f32 working set):
    #   2 logit planes + ~6 elementwise temps + accumulator, plus the
    #   double-buffered input DMA tiles in the source dtype.
    per_row = 128 * (2 * 4 + 6 * 4 + 4 + 2 * (2 * itemsize + 4))
    budget = 20 * 1024 * 1024
    rows = budget // per_row
    rows = min(rows, 2048)                     # ~3 MiB of f32 payload / step
    rows = max(8, (rows // 8) * 8)
    rows_needed = _round_up(max(1, pl.cdiv(n, 128)), 8)
    return max(8, min(rows, rows_needed))


def _focal_loss_binary(logits, targets, alpha, gamma, tile=None):
    N, C = logits.shape
    assert C == 2
    itemsize = jnp.dtype(logits.dtype).itemsize

    if tile is None:
        tile_rows = _choose_tile_rows_binary(N, itemsize)
    else:
        tile_rows = max(8, (int(tile) // 8) * 8)
        tile_rows = min(tile_rows, _round_up(max(1, pl.cdiv(N, 128)), 8))

    block_elems = tile_rows * 128
    n_pad = _round_up(N, block_elems)
    num_tiles = n_pad // block_elems
    n_rows_pad = n_pad // 128
    pad = n_pad - N

    # Wrapper layout transform: (N, 2) -> (2, N) -> (2, rows, 128).
    # Padding uses logits (+30, -30) with target 0, which yields bce = 0 and
    # pt = 1 exactly => zero contribution, so no in-kernel masking is needed.
    xt = logits.T                                              # (2, N)
    tgt = targets.reshape(-1).astype(jnp.int32)
    if pad:
        pad_block = jnp.concatenate(
            [jnp.full((1, pad), 30.0, dtype=logits.dtype),
             jnp.full((1, pad), -30.0, dtype=logits.dtype)], axis=0)
        xt = jnp.concatenate([xt, pad_block], axis=1)
        tgt = jnp.concatenate([tgt, jnp.zeros((pad,), jnp.int32)])
    x3 = xt.reshape(2, n_rows_pad, 128)
    t2 = tgt.reshape(n_rows_pad, 128)

    kernel = functools.partial(_focal_binary_kernel, alpha=float(alpha),
                               gamma=float(gamma), n_total=N)

    out = pl.pallas_call(
        kernel,
        out_shape=jax.ShapeDtypeStruct((1, 1), jnp.float32),
        grid=(num_tiles,),
        in_specs=[
            pl.BlockSpec((2, tile_rows, 128), lambda i: (0, i, 0)),   # logits
            pl.BlockSpec((tile_rows, 128), lambda i: (i, 0)),         # targets
        ],
        out_specs=pl.BlockSpec(memory_space=pltpu.MemorySpace.SMEM),
        scratch_shapes=[pltpu.VMEM((tile_rows, 128), jnp.float32)],
        compiler_params=pltpu.CompilerParams(
            dimension_semantics=("arbitrary",),          # reduction axis
            vmem_limit_bytes=48 * 1024 * 1024,
        ),
    )(x3, t2)
    return out[0, 0]


# --------------------------------------------------------------------------- #
# General (C != 2) path: row-major (tile_n, C) layout
# --------------------------------------------------------------------------- #
def _focal_rows_kernel(x_ref, t_ref, out_ref, acc_ref, *, alpha, gamma,
                       n_total, tile_n, need_mask):
    i = pl.program_id(0)
    last = pl.num_programs(0) - 1

    @pl.when(i == 0)
    def _init():
        acc_ref[...] = jnp.zeros_like(acc_ref)

    x = x_ref[...].astype(jnp.float32)         # (tile_n, C) — in-kernel cast
    t = t_ref[...]                             # (tile_n, 1) int32

    m = jnp.max(x, axis=-1, keepdims=True)
    e = jnp.exp(x - m)
    sumexp = jnp.sum(e, axis=-1, keepdims=True)

    col = lax.broadcasted_iota(jnp.int32, x.shape, 1)
    hit = col == t                                              # no f32 onehot
    x_tgt = jnp.sum(jnp.where(hit, x, 0.0), axis=-1, keepdims=True)
    e_tgt = jnp.sum(jnp.where(hit, e, 0.0), axis=-1, keepdims=True)

    bce = jnp.log(sumexp) + (m - x_tgt)                         # -log_softmax
    pt = e_tgt / sumexp                                         # = exp(-bce)

    tf = t.astype(jnp.float32)
    at = alpha * tf + (1.0 - alpha) * (1.0 - tf)
    f_loss = at * _focal_pow(1.0 - pt, gamma) * bce             # (tile_n, 1)

    if need_mask:
        # Only the final (partial) tile pays for the iota/compare/select.
        @pl.when(i == last)
        def _acc_masked():
            row = lax.broadcasted_iota(jnp.int32, f_loss.shape, 0)
            valid = (i * tile_n + row) < n_total
            acc_ref[...] += jnp.where(valid, f_loss, 0.0)

        @pl.when(i != last)
        def _acc_full():
            acc_ref[...] += f_loss
    else:
        acc_ref[...] += f_loss

    @pl.when(i == last)
    def _finalize():
        out_ref[0, 0] = jnp.sum(acc_ref[...]) * (1.0 / n_total)


def _choose_tile_rows_general(n, c, itemsize):
    c_pad = _round_up(c, 128)
    # ~4 live lane-padded f32 (tile, C_pad) tensors (x, e, masked temps) plus
    # double-buffered input DMA tiles plus lane-padded per-row temps/acc.
    per_row = 4 * (c_pad * 4) + 2 * (c * itemsize + 4) + 1024
    budget = 20 * 1024 * 1024
    tile = budget // per_row
    tile = min(tile, 16384)
    tile = max(8, (tile // 8) * 8)
    return min(tile, _round_up(n, 8))


def _focal_loss_general(logits, targets, alpha, gamma, tile=None):
    N, C = logits.shape
    itemsize = jnp.dtype(logits.dtype).itemsize

    if tile is None:
        tile_n = _choose_tile_rows_general(N, C, itemsize)
    else:
        tile_n = max(8, (int(tile) // 8) * 8)
        tile_n = min(tile_n, _round_up(N, 8))
    num_tiles = pl.cdiv(N, tile_n)
    need_mask = (N % tile_n) != 0

    targets2d = targets.reshape(N, 1).astype(jnp.int32)

    kernel = functools.partial(_focal_rows_kernel, alpha=float(alpha),
                               gamma=float(gamma), n_total=N, tile_n=tile_n,
                               need_mask=need_mask)

    out = pl.pallas_call(
        kernel,
        out_shape=jax.ShapeDtypeStruct((1, 1), jnp.float32),
        grid=(num_tiles,),
        in_specs=[
            pl.BlockSpec((tile_n, C), lambda i: (i, 0)),     # logits tile
            pl.BlockSpec((tile_n, 1), lambda i: (i, 0)),     # targets tile
        ],
        out_specs=pl.BlockSpec(memory_space=pltpu.MemorySpace.SMEM),
        scratch_shapes=[pltpu.VMEM((tile_n, 1), jnp.float32)],
        compiler_params=pltpu.CompilerParams(
            dimension_semantics=("arbitrary",),
            vmem_limit_bytes=48 * 1024 * 1024,
        ),
    )(logits, targets2d)
    return out[0, 0]


# --------------------------------------------------------------------------- #
# Public entry point + pure-JAX reference
# --------------------------------------------------------------------------- #
def focal_loss(logits, targets, alpha=0.25, gamma=2.0, tile=None):
    """logits: (N, C) float (f32/bf16); targets: (N,) integer class indices.

    NOTE: the `at` term uses the raw class index (faithful to the PyTorch
    module), so results are only meaningful for binary targets in {0, 1}.
    """
    N, C = logits.shape
    if C == 2:
        return _focal_loss_binary(logits, targets, alpha, gamma, tile)
    return _focal_loss_general(logits, targets, alpha, gamma, tile)


def focal_loss_ref(logits, targets, alpha=0.25, gamma=2.0):
    """Pure-JAX reference (mirrors the PyTorch forward)."""
    logp = jax.nn.log_softmax(logits.astype(jnp.float32), axis=-1)
    bce = -jnp.take_along_axis(logp, targets[:, None].astype(jnp.int32),
                               axis=-1)[:, 0]
    tf = targets.astype(jnp.float32)
    at = alpha * tf + (1.0 - alpha) * (1.0 - tf)
    pt = jnp.exp(-bce)
    return jnp.mean(at * (1.0 - pt) ** gamma * bce)


# --------------------------------------------------------------------------- #
# Demo / self-test
# --------------------------------------------------------------------------- #
if __name__ == "__main__":
    key = jax.random.PRNGKey(0)
    k1, k2, k3, k4 = jax.random.split(key, 4)

    # 1) Binary classification (C=2), the case the module targets.
    #    N not a multiple of 128 -> exercises the zero-contribution padding.
    N, C = 250, 2
    logits = jax.random.normal(k1, (N, C), dtype=jnp.float32)
    targets = jax.random.randint(k2, (N,), 0, C, dtype=jnp.int32)
    loss_bin = focal_loss(logits, targets, alpha=0.25, gamma=2.0)

    # 2) Binary, multi-tile: N=3000 with tile_rows=8 (1024 elems / step)
    #    -> 3 grid steps, exercises the VMEM accumulator across steps.
    N2 = 3000
    logits2 = jax.random.normal(k3, (N2, 2), dtype=jnp.float32)
    targets2 = jax.random.randint(k4, (N2,), 0, 2, dtype=jnp.int32)
    loss_bin_mt = focal_loss(logits2, targets2, alpha=0.25, gamma=2.0, tile=8)

    # 3) bf16 ingest on the binary path (cast to f32 inside the kernel).
    loss_bf16 = focal_loss(logits.astype(jnp.bfloat16), targets,
                           alpha=0.25, gamma=2.0)

    # 4) General path (C=8) with a small explicit tile -> multi-step +
    #    last-tile row masking. (Loss values follow the same `at` quirk as
    #    the PyTorch module for non-binary targets.)
    C8 = 8
    logits8 = jax.random.normal(k1, (N, C8), dtype=jnp.float32)
    targets8 = jax.random.randint(k2, (N,), 0, C8, dtype=jnp.int32)
    loss_gen = focal_loss(logits8, targets8, alpha=0.25, gamma=2.0, tile=64)

    jax.block_until_ready((loss_bin, loss_bin_mt, loss_bf16, loss_gen))

    ref_bin = focal_loss_ref(logits, targets)
    ref_bin_mt = focal_loss_ref(logits2, targets2)
    ref_bf16 = focal_loss_ref(logits.astype(jnp.bfloat16).astype(jnp.float32),
                              targets)
    ref_gen = focal_loss_ref(logits8, targets8)

    assert jnp.allclose(loss_bin, ref_bin, rtol=1e-4, atol=1e-6), (loss_bin, ref_bin)
    assert jnp.allclose(loss_bin_mt, ref_bin_mt, rtol=1e-4, atol=1e-6), (loss_bin_mt, ref_bin_mt)
    assert jnp.allclose(loss_bf16, ref_bf16, rtol=1e-4, atol=1e-6), (loss_bf16, ref_bf16)
    assert jnp.allclose(loss_gen, ref_gen, rtol=1e-4, atol=1e-6), (loss_gen, ref_gen)

    print("KERNEL_OK")
</pallas_src>

<mosaic_0001>
module attributes {stable_mosaic.version = 11 : i64} {
  func.func @_focal_binary_kernel(%arg0: i32, %arg1: memref<2x8x128xf32, #tpu.memory_space<vmem>>, %arg2: memref<8x128xi32, #tpu.memory_space<vmem>>, %arg3: memref<1x1xf32, #tpu.memory_space<smem>>, %arg4: memref<8x128xf32, #tpu.memory_space<vmem>>) attributes {dimension_semantics = [#tpu.dimension_semantics<arbitrary>], iteration_bounds = array<i64: 1>, scalar_prefetch = 0 : i64, scratch_operands = 1 : i64, tpu.core_type = #tpu.core_type<tc>, window_params = [{transform_indices = @transform_0, window_bounds = array<i64: 2, 8, 128>}, {transform_indices = @transform_1, window_bounds = array<i64: 8, 128>}, {transform_indices = @transform_2, window_bounds = array<i64: 1, 1>}]} {
    %c0_i32 = arith.constant 0 : i32
    %0 = arith.cmpi eq, %arg0, %c0_i32 : i32
    %1 = arith.extui %0 : i1 to i32
    %c0_i32_0 = arith.constant 0 : i32
    %2 = arith.cmpi ne, %1, %c0_i32_0 : i32
    scf.if %2 {
      %cst_19 = arith.constant 0.000000e+00 : f32
      %45 = vector.broadcast %cst_19 : f32 to vector<8x128xf32>
      %c0_20 = arith.constant 0 : index
      %c0_21 = arith.constant 0 : index
      %46 = vector.load %arg4[%c0_20, %c0_21] : memref<8x128xf32, #tpu.memory_space<vmem>>, vector<8x128xf32>
      tpu.vector_store %arg4[%c0_20, %c0_21], %45 {strides = array<i32>} : memref<8x128xf32, #tpu.memory_space<vmem>>, vector<8x128xf32>,
    } else {
    }
    %c0 = arith.constant 0 : index
    %c0_1 = arith.constant 0 : index
    %c0_2 = arith.constant 0 : index
    %3 = vector.load %arg1[%c0, %c0_1, %c0_2] : memref<2x8x128xf32, #tpu.memory_space<vmem>>, vector<1x8x128xf32>
    %4 = vector.shape_cast %3 : vector<1x8x128xf32> to vector<8x128xf32>
    %c1 = arith.constant 1 : index
    %c0_3 = arith.constant 0 : index
    %c0_4 = arith.constant 0 : index
    %5 = vector.load %arg1[%c1, %c0_3, %c0_4] : memref<2x8x128xf32, #tpu.memory_space<vmem>>, vector<1x8x128xf32>
    %6 = vector.shape_cast %5 : vector<1x8x128xf32> to vector<8x128xf32>
    %c0_5 = arith.constant 0 : index
    %c0_6 = arith.constant 0 : index
    %7 = vector.load %arg2[%c0_5, %c0_6] : memref<8x128xi32, #tpu.memory_space<vmem>>, vector<8x128xi32>
    %8 = arith.maximumf %4, %6 : vector<8x128xf32>
    %9 = arith.subf %4, %6 : vector<8x128xf32>
    %10 = math.absf %9 : vector<8x128xf32>
    %cst = arith.constant 0.000000e+00 : f32
    %11 = vector.broadcast %cst : f32 to vector<8x128xf32>
    %12 = arith.subf %11, %10 : vector<8x128xf32>
    %13 = math.exp %12 : vector<8x128xf32>
    %cst_7 = arith.constant 1.000000e+00 : f32
    %14 = vector.broadcast %cst_7 : f32 to vector<8x128xf32>
    %15 = arith.addf %14, %13 : vector<8x128xf32>
    %16 = math.log %15 : vector<8x128xf32>
    %17 = arith.addf %8, %16 : vector<8x128xf32>
    %c1_i32 = arith.constant 1 : i32
    %18 = vector.broadcast %c1_i32 : i32 to vector<8x128xi32>
    %19 = arith.cmpi eq, %7, %18 : vector<8x128xi32>
    %20 = arith.select %19, %6, %4 : vector<8x128xi1>, vector<8x128xf32>
    %21 = arith.subf %17, %20 : vector<8x128xf32>
    %22 = arith.cmpf oeq, %20, %8 : vector<8x128xf32>
    %cst_8 = arith.constant 1.000000e+00 : f32
    %23 = vector.broadcast %cst_8 : f32 to vector<8x128xf32>
    %24 = arith.select %22, %23, %13 : vector<8x128xi1>, vector<8x128xf32>
    %25 = arith.divf %24, %15 : vector<8x128xf32>
    %26 = arith.sitofp %7 : vector<8x128xi32> to vector<8x128xf32>
    %cst_9 = arith.constant 2.500000e-01 : f32
    %27 = vector.broadcast %cst_9 : f32 to vector<8x128xf32>
    %28 = arith.mulf %27, %26 : vector<8x128xf32>
    %cst_10 = arith.constant 1.000000e+00 : f32
    %29 = vector.broadcast %cst_10 : f32 to vector<8x128xf32>
    %30 = arith.subf %29, %26 : vector<8x128xf32>
    %cst_11 = arith.constant 7.500000e-01 : f32
    %31 = vector.broadcast %cst_11 : f32 to vector<8x128xf32>
    %32 = arith.mulf %31, %30 : vector<8x128xf32>
    %33 = arith.addf %28, %32 : vector<8x128xf32>
    %c0_12 = arith.constant 0 : index
    %c0_13 = arith.constant 0 : index
    %34 = vector.load %arg4[%c0_12, %c0_13] : memref<8x128xf32, #tpu.memory_space<vmem>>, vector<8x128xf32>
    %cst_14 = arith.constant 1.000000e+00 : f32
    %35 = vector.broadcast %cst_14 : f32 to vector<8x128xf32>
    %36 = arith.subf %35, %25 : vector<8x128xf32>
    %37 = arith.mulf %36, %36 : vector<8x128xf32>
    %38 = arith.mulf %33, %37 : vector<8x128xf32>
    %39 = arith.mulf %38, %21 : vector<8x128xf32>
    %40 = arith.addf %34, %39 : vector<8x128xf32>
    %c0_15 = arith.constant 0 : index
    %c0_16 = arith.constant 0 : index
    %41 = vector.load %arg4[%c0_15, %c0_16] : memref<8x128xf32, #tpu.memory_space<vmem>>, vector<8x128xf32>
    tpu.vector_store %arg4[%c0_15, %c0_16], %40 {strides = array<i32>} : memref<8x128xf32, #tpu.memory_space<vmem>>, vector<8x128xf32>,
    %c0_i32_17 = arith.constant 0 : i32
    %42 = arith.cmpi eq, %arg0, %c0_i32_17 : i32
    %43 = arith.extui %42 : i1 to i32
    %c0_i32_18 = arith.constant 0 : i32
    %44 = arith.cmpi ne, %43, %c0_i32_18 : i32
    scf.if %44 {
      %c0_19 = arith.constant 0 : index
      %c0_20 = arith.constant 0 : index
      %45 = vector.load %arg4[%c0_19, %c0_20] : memref<8x128xf32, #tpu.memory_space<vmem>>, vector<8x128xf32>
      %46 = vector.shape_cast %45 : vector<8x128xf32> to vector<1x8x128xf32>
      %cst_21 = arith.constant dense<0.000000e+00> : vector<1xf32>
      %47 = vector.multi_reduction <add>, %46, %cst_21 [1, 2] : vector<1x8x128xf32> to vector<1xf32>
      %48 = vector.shape_cast %47 : vector<1xf32> to vector<1x1x1xf32>
      %49 = vector.extract %48[0, 0, 0] : f32 from vector<1x1x1xf32>
      %cst_22 = arith.constant 4.000000e-03 : f32
      %50 = arith.mulf %49, %cst_22 : f32
      %c0_23 = arith.constant 0 : index
      %c0_24 = arith.constant 0 : index
      %51 = memref.load %arg3[%c0_23, %c0_24] : memref<1x1xf32, #tpu.memory_space<smem>>
      memref.store %50, %arg3[%c0_23, %c0_24] : memref<1x1xf32, #tpu.memory_space<smem>>
    } else {
    }
    return
  }
  func.func @transform_0(%arg0: i32) -> (i32, i32, i32) {
    %c0_i32 = arith.constant 0 : i32
    %c0_i32_0 = arith.constant 0 : i32
    %c0_i32_1 = arith.constant 0 : i32
    return %c0_i32, %arg0, %c0_i32_0 : i32, i32, i32
  }
  func.func @transform_1(%arg0: i32) -> (i32, i32) {
    %c0_i32 = arith.constant 0 : i32
    %c0_i32_0 = arith.constant 0 : i32
    return %arg0, %c0_i32 : i32, i32
  }
  func.func @transform_2(%arg0: i32) -> (i32, i32) {
    %c0_i32 = arith.constant 0 : i32
    %c0_i32_0 = arith.constant 0 : i32
    %c0_i32_1 = arith.constant 0 : i32
    return %c0_i32, %c0_i32_0 : i32, i32
  }
}

</mosaic_0001>

<bundles_post_ra>
// kernel: tpu_custom_call.1
= control target key start
LH: loop header
LB: loop body
LE: loop exit
PB: predicated region body
PF: predicated region fallthrough
CT: control target
= control target key end

     0   :  { %7 = vsyncpa [#allocation4], 0  ;;  %s203_s0 = inlined_call_operand.hbm [shape: f32[2,8,128], index: 0, kind: input, shape index: {}]   ;;  %s204_s1 = inlined_call_operand.hbm [shape: s32[8,128], index: 1, kind: input, shape index: {}]   ;;  %s205_s2 = inlined_call_operand.hbm [shape: f32[1,1], index: 2, kind: output, shape index: {}]  }
   0x1   :  { %8 = vsyncpa [#allocation7], 0 }
   0x2   :  { %9 = vsyncpa [#allocation5], 0  ;;  %s174_s9 = smov [#allocation3]  }
   0x3   :  { %s15_s10 = sshll.u32 %s174_s9, 4  ;;  %s16_s10 = int_to_ptr.vmem [resolvable:$true] %s15_s10 }
   0x4   :  { %s128_s11 = scalar_lea.vmem %s16_s10, 256  ;;  %p133_p1 = scmp.lt.s32.totalorder %s16_s10, %s16_s10 }
   0x5   :  { %p129_p0 = scmp.ne.s32.totalorder %s16_s10, %s128_s11  ;;  %p134_p2 = scmp.lt.s32.totalorder %s128_s11, %s128_s11 }
   0x7   :  { %p135_p3 = por %p134_p2, %p133_p1 }
   0x9   :  { %p136_p4 = pnand %p135_p3, %p129_p0 }
   0xb   :  { %139 = shalt.err (!%p136_p4)
}
   0xc   :  { %s175_s12 = smov 128   ;;  %s176_s13 = smov 8  }
   0xd   :  { %21 = dma.hbm_to_vmem [thread:$0]  %s203_s0, 256, %s16_s10, [#allocation4], %s175_s12, %s175_s12, %s176_s13  }
   0xe   :  { %s177_s16 = smov [#allocation6]  }
   0xf   :  { %s28_s17 = sshll.u32 %s177_s16, 4  ;;  %s29_s17 = int_to_ptr.vmem [resolvable:$true] %s28_s17 }
  0x10   :  { %s148_s18 = scalar_lea.vmem %s29_s17, 128  ;;  %p153_p6 = scmp.lt.s32.totalorder %s29_s17, %s29_s17 }
  0x11   :  { %p149_p5 = scmp.ne.s32.totalorder %s29_s17, %s148_s18  ;;  %p154_p7 = scmp.lt.s32.totalorder %s148_s18, %s148_s18 }
  0x13   :  { %p155_p8 = por %p154_p7, %p153_p6 }
  0x15   :  { %p156_p9 = pnand %p155_p8, %p149_p5 }
  0x17   :  { %159 = shalt.err (!%p156_p9)
}
  0x18   :  { %31 = dma.hbm_to_vmem [thread:$0]  %s204_s1, 128, %s29_s17, [#allocation7]  }
  0x19   :  { %168 = dma.done.wait [#allocation4], 256  }
  0x1a   :  { %169 = vsyncadd [#allocation4], 4294967040 }
  0x1b   :  { %170 = dma.done.wait [#allocation7], 128  }
  0x1c   :  { %171 = vsyncadd [#allocation7], 4294967168  ;;  %v43_v0 = vld [vmem:[#allocation3] sm:$0xff]  ;;  %v45_v1 = vld [vmem:[#allocation3 + $0x8] sm:$0xff]  ;;  %s178_s21 = smov [#allocation8]  }
  0x1d   :  { %v48_v2 = vsub.f32 %v43_v0, %v45_v1  ;;  %v46_v8 = vld [vmem:[#allocation6] sm:$0xff]  ;;  %v47_v9 = vmax.f32 %v43_v0, %v45_v1 }
  0x1e   :  { %vm57_vm0 = vcmp.eq.s32.totalorder %v46_v8, 1  ;;  %v64_v10 = vcvt.s32.f32 %v46_v8 }
  0x1f   :  { %v49_v3 = vand.u32 2147483647, %v48_v2  ;;  %v58_v11 = vsel %vm57_vm0, %v45_v1, %v43_v0 }
  0x20   :  { %vm60_vm1 = vcmp.eq.f32.partialorder %v58_v11, %v47_v9  ;;  %v66_v12 = vsub.f32 1.0, %v64_v10  ;;  %v65_v15 = vmul.f32 0.25, %v64_v10 }
  0x21   :  { %v50_v4 = vsub.f32 0.0, %v49_v3 }
  0x22   :  { %v67_v16 = vmul.f32 0.75, %v66_v12 }
  0x23   :  { %v51_v5 = vmul.f32 1.442695, %v50_v4 }
  0x24   :  { %v68_v21 = vadd.f32 %v67_v16, %v65_v15 }
  0x25   :  { %114 = vpow2.f32 %v51_v5 }
  0x32   :  { %v115_v6 = vpop.eup %114 }
  0x33   :  { %v53_v7 = vadd.f32 1.0, %v115_v6  ;;  %v61_v13 = vsel %vm60_vm1, 1.0, %v115_v6 }
  0x35   :  { %116 = vlog2.f32 %v53_v7 }
  0x36   :  { %118 = vrcp.f32 %v53_v7 }
  0x42   :  { %v117_v14 = vpop.eup %116 }
  0x43   :  { %v119_v17 = vpop.eup %118  ;;  %v55_v18 = vmul.f32 0.6931472, %v117_v14 }
  0x44   :  { %v63_v19 = vmul.f32 %v119_v17, %v61_v13 }
  0x45   :  { %v56_v20 = vadd.f32 %v55_v18, %v47_v9 }
  0x46   :  { %v70_v22 = vsub.f32 1.0, %v63_v19 }
  0x47   :  { %v59_v23 = vsub.f32 %v56_v20, %v58_v11 }
  0x48   :  { %v71_v24 = vmul.f32 %v70_v22, %v70_v22 }
  0x4a   :  { %v72_v25 = vmul.f32 %v71_v24, %v68_v21 }
  0x4c   :  { %v73_v26 = vmul.f32 %v72_v25, %v59_v23 }
  0x4e   :  { %80 = vadd.xlane.f32.xlu0 %v73_v26 }
  0xd7   :  { %v81_v27 = vpop.xlane.xlu0 %80 }
  0xd8   :  { %v82_v28 = vrot.slane %v81_v27, 4 }
  0xda   :  { %v83_v29 = vadd.f32 %v82_v28, %v81_v27 }
  0xdc   :  { %v84_v30 = vrot.slane %v83_v29, 2 }
  0xde   :  { %v85_v31 = vadd.f32 %v84_v30, %v83_v29 }
  0xe0   :  { %v86_v32 = vrot.slane %v85_v31, 1 }
  0xe2   :  { %v87_v33 = vadd.f32 %v86_v32, %v85_v31 }
  0xe4   :  { %107 = vpush %v87_v33 }
 0x115   :  { %s108_s0 = spop %107 }
 0x116   :  { %s89_s1 = smul.f32 0.004, %s108_s0 }
 0x118   :  { %91 = sst [smem:[#allocation8]] %s89_s1 }
 0x119   :  { %99 = dma.smem_to_hbm %s178_s21, 16, %s205_s2, [#allocation5]  }
 0x11a   :  { %172 = dma.done.wait [#allocation5], 16  }
 0x11b   :  { %173 = vsyncadd [#allocation5], 4294967280 }
 0x11c   :  { %103 = sfence }
 0x11d   :  { %104 = vsyncpa [#allocation4], 1 }
 0x11e   :  { %105 = vsyncpa [#allocation7], 1 }
 0x11f   :  { %106 = vsyncpa [#allocation5], 1 }

</bundles_post_ra>
